<compile_context>
chip_gen: v5e
topology: v5e:2x2
jax: 0.10.0
libtpu: 0.0.40
codegen_flags: <defaults>
</compile_context>

<pallas_src>
import jax
import jax.numpy as jnp
from jax.experimental import pallas as pl
from jax.experimental.pallas import tpu as pltpu

# ---------------- small deterministic config ----------------
B = 2                      # batch
S = 8                      # sequence length
H = 32                     # hidden_size / embedding_dim
N_LAYERS = 13              # hidden states per stream (embeddings + 12 layers)
N_C = 2 * N_LAYERS         # two streams concatenated -> 26 channels
F = 16                     # n_feature_maps
WEIGHT_LENGTHS = (3, 4, 5)
N_LABELS = 2
PAD_MAX = max(WEIGHT_LENGTHS) - 1
CH = N_C * H               # 832

# column offsets of each width's tap-block inside the concatenated conv weight
_offs, _o = [], 0
for _w in WEIGHT_LENGTHS:
    _offs.append(_o)
    _o += _w * F
COL_OFFS = tuple(_offs)    # (0, 3F, 7F)
NF_TOT = _o                # (3+4+5)*F = 192
N_TAIL_ROWS = 2 + N_LABELS # row0: conv biases, row1: fc bias, rows 2..: fc weight


def kim_cnn_kernel(x_ref, w_ref, tail_ref, out_ref, ypad_ref):
    # x_ref:    [B, S, CH]                unpadded activations, channel-major lanes
    # w_ref:    [CH, NF_TOT]              all (width, tap) conv weights, column blocks
    # tail_ref: [N_TAIL_ROWS, 3*F]        row0 = conv biases, row1[:N_LABELS] = fc bias,
    #                                     rows 2.. = fc weight (torch [n_labels, 3F])
    # ypad_ref: [B, S+2*PAD_MAX, NF_TOT]  VMEM scratch: zero-padded per-tap responses
    Bk, Sk, CHk = x_ref.shape

    # --- single MXU matmul for every (width, tap) pair at once ---------------
    x = x_ref[...].reshape(Bk * Sk, CHk)                       # tile-aligned reshape
    y = jnp.dot(x, w_ref[...], preferred_element_type=jnp.float32)  # [B*S, NF_TOT]

    # --- in-kernel zero padding of the (narrow) tap responses ----------------
    ypad_ref[...] = jnp.zeros_like(ypad_ref)
    ypad_ref[:, PAD_MAX:PAD_MAX + Sk, :] = y.reshape(Bk, Sk, NF_TOT)
    ypad = ypad_ref[...]

    # --- per-width conv = shift-add of tap columns, then temporal max-pool ---
    pooled = []
    for w, col in zip(WEIGHT_LENGTHS, COL_OFFS):
        L = Sk + w - 1                       # conv output length (padding = w-1 each side)
        base0 = PAD_MAX - (w - 1)            # offset of tap 0 inside the padded sequence
        acc = ypad[:, base0:base0 + L, col:col + F]
        for dw in range(1, w):               # static unroll over remaining filter taps
            bs = base0 + dw
            acc = acc + ypad[:, bs:bs + L, col + dw * F: col + (dw + 1) * F]
        pooled.append(jnp.max(acc, axis=1))  # max_pool1d over time -> [B, F]
    pooled = jnp.concatenate(pooled, axis=1)                   # [B, 3*F]

    # --- bias + ReLU hoisted past the max-pool (monotone), single broadcast --
    tail = tail_ref[...]
    feat = jnp.maximum(pooled + tail[0:1, :], 0.0)             # [B, 3*F]
    # dropout: identity in eval mode

    # --- tiny FC on the VPU: broadcast-multiply + lane reduce ----------------
    fcw = tail[2:2 + N_LABELS, :]                              # [N_LABELS, 3*F]
    fcb = tail[1:2, :N_LABELS]                                 # [1, N_LABELS]
    logits = jnp.sum(feat[:, None, :] * fcw[None, :, :], axis=-1) + fcb
    out_ref[...] = logits.astype(out_ref.dtype)


@jax.jit
def kim_cnn_two_streams_ft(hidden_states_cat, conv_params, fc_w, fc_b):
    """hidden_states_cat: [B, 2*13, S, H] == torch.cat([stack(h1), stack(h2)], dim=1)."""
    Bx, Cx, Sx, Hx = hidden_states_cat.shape
    CHx = Cx * Hx

    # NCHW -> [B, S, C*H]  (channel-major flatten, matching the conv-weight flatten)
    # TODO(synk): fold this transpose into the kernel (einsum layout) once B*S grows
    # enough for the extra HBM pass to matter; at realistic sizes also precompute
    # w_all / tail once instead of per call.
    x = jnp.transpose(hidden_states_cat, (0, 2, 1, 3)).reshape(Bx, Sx, CHx)

    # One tap/width-concatenated conv weight  [C*H, sum_w(w*F)] = [832, 192].
    w_cols, bias_cols = [], []
    for w, (cw, cb) in zip(WEIGHT_LENGTHS, conv_params):
        # torch Conv2d weight [F, C, w, H] -> rows (c,h), columns (dw, f)
        w_cols.append(jnp.transpose(cw, (1, 3, 2, 0)).reshape(CHx, w * F))
        bias_cols.append(cb)
    w_all = jnp.concatenate(w_cols, axis=1)                    # [CH, NF_TOT]

    # Packed bias / FC blob (single small VMEM argument).
    tail = jnp.zeros((N_TAIL_ROWS, len(WEIGHT_LENGTHS) * F), jnp.float32)
    tail = tail.at[0, :].set(jnp.concatenate(bias_cols))       # conv biases [3*F]
    tail = tail.at[1, :N_LABELS].set(fc_b)                     # fc bias
    tail = tail.at[2:2 + N_LABELS, :].set(fc_w)                # fc weight [N_LABELS, 3*F]

    vmem = lambda: pl.BlockSpec(memory_space=pltpu.MemorySpace.VMEM)
    return pl.pallas_call(
        kim_cnn_kernel,
        out_shape=jax.ShapeDtypeStruct((Bx, N_LABELS), jnp.float32),
        in_specs=[vmem(), vmem(), vmem()],
        out_specs=vmem(),
        scratch_shapes=[pltpu.VMEM((Bx, Sx + 2 * PAD_MAX, NF_TOT), jnp.float32)],
        # TODO(synk): when B grows, add a batch grid + compiler_params with
        # dimension_semantics=("parallel",) so v7x's two TensorCores split it,
        # and size blocks against v7x's 64 MiB VMEM.
    )(x, w_all, tail)


def reference_forward(hidden_states_cat, conv_params, fc_w, fc_b):
    """Pure-JAX reference mirroring the PyTorch forward (eval mode)."""
    x = hidden_states_cat                                      # NCHW
    feats = []
    for w, (cw, cb) in zip(WEIGHT_LENGTHS, conv_params):
        y = jax.lax.conv_general_dilated(
            x, cw, window_strides=(1, 1),
            padding=((w - 1, w - 1), (0, 0)),
            dimension_numbers=("NCHW", "OIHW", "NCHW"),
            precision=jax.lax.Precision.HIGHEST)
        y = y + cb[None, :, None, None]
        y = jax.nn.relu(y)[..., 0]                             # [B, F, S+w-1]
        feats.append(jnp.max(y, axis=2))                       # [B, F]
    feat = jnp.concatenate(feats, axis=1)
    return jnp.dot(feat, fc_w.T, precision=jax.lax.Precision.HIGHEST) + fc_b


if __name__ == "__main__":
    key = jax.random.PRNGKey(0)
    k = jax.random.split(key, 10)

    # TODO(synk): word_model / word_model2 are external pretrained transformers;
    # their hidden_states (13 tensors of [B, S, H] per stream) are synthesized here.
    x1 = jax.random.normal(k[0], (B, N_LAYERS, S, H), jnp.float32)   # torch.stack(h1, dim=1)
    x2 = jax.random.normal(k[1], (B, N_LAYERS, S, H), jnp.float32)   # torch.stack(h2, dim=1)
    hidden = jnp.concatenate([x1, x2], axis=1)                       # [B, 26, S, H]

    conv_params = []
    for i, w in enumerate(WEIGHT_LENGTHS):
        cw = 0.05 * jax.random.normal(k[2 + i], (F, N_C, w, H), jnp.float32)
        cb = 0.05 * jax.random.normal(k[5 + i], (F,), jnp.float32)
        conv_params.append((cw, cb))
    fc_w = 0.1 * jax.random.normal(k[8], (N_LABELS, len(WEIGHT_LENGTHS) * F), jnp.float32)
    fc_b = 0.1 * jax.random.normal(k[9], (N_LABELS,), jnp.float32)

    # TODO(synk): training branch (dropout RNG + CrossEntropyLoss on softmax) not
    # implemented; module returns (None, logits) in eval mode, we return logits.
    logits = jax.block_until_ready(kim_cnn_two_streams_ft(hidden, conv_params, fc_w, fc_b))
    ref = reference_forward(hidden, conv_params, fc_w, fc_b)
    assert logits.shape == (B, N_LABELS)
    assert jnp.allclose(logits, ref, rtol=1e-4, atol=1e-4), (logits, ref)
    print("KERNEL_OK")
</pallas_src>

<mosaic_0001>
module attributes {stable_mosaic.version = 11 : i64} {
  func.func @kim_cnn_kernel(%arg0: memref<2x8x832xf32, #tpu.memory_space<vmem>>, %arg1: memref<832x192xf32, #tpu.memory_space<vmem>>, %arg2: memref<4x48xf32, #tpu.memory_space<vmem>>, %arg3: memref<2x2xf32, #tpu.memory_space<vmem>>, %arg4: memref<2x16x192xf32, #tpu.memory_space<vmem>>) attributes {dimension_semantics = [], scalar_prefetch = 0 : i64, scratch_operands = 1 : i64, tpu.core_type = #tpu.core_type<tc>} {
    %c0 = arith.constant 0 : index
    %c0_0 = arith.constant 0 : index
    %c0_1 = arith.constant 0 : index
    %0 = vector.load %arg0[%c0, %c0_0, %c0_1] : memref<2x8x832xf32, #tpu.memory_space<vmem>>, vector<2x8x832xf32>
    %1 = vector.shape_cast %0 : vector<2x8x832xf32> to vector<16x832xf32>
    %c0_2 = arith.constant 0 : index
    %c0_3 = arith.constant 0 : index
    %2 = vector.load %arg1[%c0_2, %c0_3] : memref<832x192xf32, #tpu.memory_space<vmem>>, vector<832x192xf32>
    %cst = arith.constant dense<0.000000e+00> : vector<16x192xf32>
    %3 = tpu.matmul %1, %2, %cst {dimension_numbers = #tpu.dot_dimension_numbers<[1], [0], [0], [1], [0, 0, 1, 1], [], []>} : vector<16x832xf32>, vector<832x192xf32>, vector<16x192xf32> -> vector<16x192xf32>
    %cst_4 = arith.constant 0.000000e+00 : f32
    %4 = vector.broadcast %cst_4 : f32 to vector<2x16x192xf32>
    %c0_5 = arith.constant 0 : index
    %c0_6 = arith.constant 0 : index
    %c0_7 = arith.constant 0 : index
    %5 = vector.load %arg4[%c0_5, %c0_6, %c0_7] : memref<2x16x192xf32, #tpu.memory_space<vmem>>, vector<2x16x192xf32>
    tpu.vector_store %arg4[%c0_5, %c0_6, %c0_7], %4 {strides = array<i32>} : memref<2x16x192xf32, #tpu.memory_space<vmem>>, vector<2x16x192xf32>,
    %6 = vector.shape_cast %3 : vector<16x192xf32> to vector<2x8x192xf32>
    %c0_8 = arith.constant 0 : index
    %c4 = arith.constant 4 : index
    %c0_9 = arith.constant 0 : index
    %7 = vector.load %arg4[%c0_8, %c4, %c0_9] : memref<2x16x192xf32, #tpu.memory_space<vmem>>, vector<2x8x192xf32>
    tpu.vector_store %arg4[%c0_8, %c4, %c0_9], %6 {strides = array<i32>} : memref<2x16x192xf32, #tpu.memory_space<vmem>>, vector<2x8x192xf32>,
    %c0_10 = arith.constant 0 : index
    %c0_11 = arith.constant 0 : index
    %c0_12 = arith.constant 0 : index
    %8 = vector.load %arg4[%c0_10, %c0_11, %c0_12] : memref<2x16x192xf32, #tpu.memory_space<vmem>>, vector<2x16x192xf32>
    %9 = vector.extract_strided_slice %8 {offsets = [0, 2, 0], sizes = [2, 10, 16], strides = [1, 1, 1]} : vector<2x16x192xf32> to vector<2x10x16xf32>
    %10 = vector.extract_strided_slice %8 {offsets = [0, 3, 16], sizes = [2, 10, 16], strides = [1, 1, 1]} : vector<2x16x192xf32> to vector<2x10x16xf32>
    %11 = arith.addf %9, %10 : vector<2x10x16xf32>
    %12 = vector.extract_strided_slice %8 {offsets = [0, 4, 32], sizes = [2, 10, 16], strides = [1, 1, 1]} : vector<2x16x192xf32> to vector<2x10x16xf32>
    %13 = arith.addf %11, %12 : vector<2x10x16xf32>
    %cst_13 = arith.constant dense<0xFF800000> : vector<2x16xf32>
    %14 = vector.multi_reduction <maximumf>, %13, %cst_13 [1] : vector<2x10x16xf32> to vector<2x16xf32>
    %15 = vector.extract_strided_slice %8 {offsets = [0, 1, 48], sizes = [2, 11, 16], strides = [1, 1, 1]} : vector<2x16x192xf32> to vector<2x11x16xf32>
    %16 = vector.extract_strided_slice %8 {offsets = [0, 2, 64], sizes = [2, 11, 16], strides = [1, 1, 1]} : vector<2x16x192xf32> to vector<2x11x16xf32>
    %17 = arith.addf %15, %16 : vector<2x11x16xf32>
    %18 = vector.extract_strided_slice %8 {offsets = [0, 3, 80], sizes = [2, 11, 16], strides = [1, 1, 1]} : vector<2x16x192xf32> to vector<2x11x16xf32>
    %19 = arith.addf %17, %18 : vector<2x11x16xf32>
    %20 = vector.extract_strided_slice %8 {offsets = [0, 4, 96], sizes = [2, 11, 16], strides = [1, 1, 1]} : vector<2x16x192xf32> to vector<2x11x16xf32>
    %21 = arith.addf %19, %20 : vector<2x11x16xf32>
    %cst_14 = arith.constant dense<0xFF800000> : vector<2x16xf32>
    %22 = vector.multi_reduction <maximumf>, %21, %cst_14 [1] : vector<2x11x16xf32> to vector<2x16xf32>
    %23 = vector.extract_strided_slice %8 {offsets = [0, 0, 112], sizes = [2, 12, 16], strides = [1, 1, 1]} : vector<2x16x192xf32> to vector<2x12x16xf32>
    %24 = vector.extract_strided_slice %8 {offsets = [0, 1, 128], sizes = [2, 12, 16], strides = [1, 1, 1]} : vector<2x16x192xf32> to vector<2x12x16xf32>
    %25 = arith.addf %23, %24 : vector<2x12x16xf32>
    %26 = vector.extract_strided_slice %8 {offsets = [0, 2, 144], sizes = [2, 12, 16], strides = [1, 1, 1]} : vector<2x16x192xf32> to vector<2x12x16xf32>
    %27 = arith.addf %25, %26 : vector<2x12x16xf32>
    %28 = vector.extract_strided_slice %8 {offsets = [0, 3, 160], sizes = [2, 12, 16], strides = [1, 1, 1]} : vector<2x16x192xf32> to vector<2x12x16xf32>
    %29 = arith.addf %27, %28 : vector<2x12x16xf32>
    %30 = vector.extract_strided_slice %8 {offsets = [0, 4, 176], sizes = [2, 12, 16], strides = [1, 1, 1]} : vector<2x16x192xf32> to vector<2x12x16xf32>
    %31 = arith.addf %29, %30 : vector<2x12x16xf32>
    %cst_15 = arith.constant dense<0xFF800000> : vector<2x16xf32>
    %32 = vector.multi_reduction <maximumf>, %31, %cst_15 [1] : vector<2x12x16xf32> to vector<2x16xf32>
    %33 = tpu.concatenate %14, %22, %32 in 1 : vector<2x16xf32>, vector<2x16xf32>, vector<2x16xf32> -> vector<2x48xf32>
    %c0_16 = arith.constant 0 : index
    %c0_17 = arith.constant 0 : index
    %34 = vector.load %arg2[%c0_16, %c0_17] : memref<4x48xf32, #tpu.memory_space<vmem>>, vector<4x48xf32>
    %35 = vector.extract_strided_slice %34 {offsets = [0, 0], sizes = [1, 48], strides = [1, 1]} : vector<4x48xf32> to vector<1x48xf32>
    %36 = vector.broadcast %35 : vector<1x48xf32> to vector<2x48xf32>
    %37 = arith.addf %33, %36 : vector<2x48xf32>
    %cst_18 = arith.constant 0.000000e+00 : f32
    %38 = vector.broadcast %cst_18 : f32 to vector<2x48xf32>
    %39 = arith.maximumf %37, %38 : vector<2x48xf32>
    %40 = vector.extract_strided_slice %34 {offsets = [2, 0], sizes = [2, 48], strides = [1, 1]} : vector<4x48xf32> to vector<2x48xf32>
    %41 = vector.extract_strided_slice %34 {offsets = [1, 0], sizes = [1, 2], strides = [1, 1]} : vector<4x48xf32> to vector<1x2xf32>
    %42 = vector.shape_cast %39 : vector<2x48xf32> to vector<2x1x48xf32>
    %43 = vector.shape_cast %40 : vector<2x48xf32> to vector<1x2x48xf32>
    %44 = vector.broadcast %42 : vector<2x1x48xf32> to vector<2x2x48xf32>
    %45 = vector.broadcast %43 : vector<1x2x48xf32> to vector<2x2x48xf32>
    %46 = arith.mulf %44, %45 : vector<2x2x48xf32>
    %cst_19 = arith.constant dense<0.000000e+00> : vector<2x2xf32>
    %47 = vector.multi_reduction <add>, %46, %cst_19 [2] : vector<2x2x48xf32> to vector<2x2xf32>
    %48 = vector.broadcast %41 : vector<1x2xf32> to vector<2x2xf32>
    %49 = arith.addf %47, %48 : vector<2x2xf32>
    %c0_20 = arith.constant 0 : index
    %c0_21 = arith.constant 0 : index
    %50 = vector.load %arg3[%c0_20, %c0_21] : memref<2x2xf32, #tpu.memory_space<vmem>>, vector<2x2xf32>
    tpu.vector_store %arg3[%c0_20, %c0_21], %49 {strides = array<i32>} : memref<2x2xf32, #tpu.memory_space<vmem>>, vector<2x2xf32>,
    return
  }
}

</mosaic_0001>

<bundles_post_ra>
// kernel: kim_cnn_two_streams_ft.1
= control target key start
LH: loop header
LB: loop body
LE: loop exit
PB: predicated region body
PF: predicated region fallthrough
CT: control target
= control target key end

     0   :  { %vm237_vm0 = vcmask 523264   ;;  %s1807_s0 = inlined_call_operand.vmem [shape: f32[2,8,832], index: 0, kind: input, shape index: {}]   ;;  %s1808_s1 = inlined_call_operand.vmem [shape: f32[832,192], index: 1, kind: input, shape index: {}]   ;;  %s1809_s2 = inlined_call_operand.vmem [shape: f32[4,48], index: 2, kind: input, shape index: {}]   ;;  %s1810_s3 = inlined_call_operand.hbm [shape: f32[2,2], index: 3, kind: output, shape index: {}]  }
   0x1   :  { %v59_v0 = vld [vmem:[%s1808_s1 + $0xf0] sm:$0xff]  ;;  %v57_v2 = vld [vmem:[%s1808_s1 + $0xe0] sm:$0xff] }
   0x2   :  { %v123_v1 = vld [vmem:[%s1808_s1 + $0x2f0] sm:$0xff]  ;;  %244 = vmatpush.msra.mxu0 %v59_v0  ;;  %v121_v4 = vld [vmem:[%s1808_s1 + $0x2e0] sm:$0xff] }
   0x3   :  { %290 = vmatpush.msra.mxu2 %v123_v1  ;;  %v91_v3 = vld [vmem:[%s1808_s1 + $0x1f0] sm:$0xff]  ;;  %v89_v7 = vld [vmem:[%s1808_s1 + $0x1e0] sm:$0xff] }
   0x4   :  { %v155_v5 = vld [vmem:[%s1808_s1 + $0x3f0] sm:$0xff]  ;;  %267 = vmatpush.msra.mxu1 %v91_v3  ;;  %245 = vmatpush.msra.mxu0 %v57_v2  ;;  %v153_v9 = vld [vmem:[%s1808_s1 + $0x3e0] sm:$0xff] }
   0x5   :  { %313 = vmatpush.msra.mxu3 %v155_v5  ;;  %v55_v6 = vld [vmem:[%s1808_s1 + $0xd0] sm:$0xff]  ;;  %291 = vmatpush.msra.mxu2 %v121_v4  ;;  %v53_v11 = vld [vmem:[%s1808_s1 + $0xc0] sm:$0xff]  ;;  %v60_v5 = vld [vmem:[%s1808_s1 + $0xf8] sm:$0xff] }
   0x6   :  { %v119_v8 = vld [vmem:[%s1808_s1 + $0x2d0] sm:$0xff]  ;;  %268 = vmatpush.msra.mxu1 %v89_v7  ;;  %v117_v12 = vld [vmem:[%s1808_s1 + $0x2c0] sm:$0xff]  ;;  %246 = vmatpush.msra.mxu0 %v55_v6 }
   0x7   :  { %v87_v10 = vld [vmem:[%s1808_s1 + $0x1d0] sm:$0xff]  ;;  %314 = vmatpush.msra.mxu3 %v153_v9  ;;  %292 = vmatpush.msra.mxu2 %v119_v8  ;;  %v85_v14 = vld [vmem:[%s1808_s1 + $0x1c0] sm:$0xff]  ;;  %v58_v9 = vld [vmem:[%s1808_s1 + $0xe8] sm:$0xff] }
   0x8   :  { %v151_v13 = vld [vmem:[%s1808_s1 + $0x3d0] sm:$0xff]  ;;  %v149_v15 = vld [vmem:[%s1808_s1 + $0x3c0] sm:$0xff]  ;;  %269 = vmatpush.msra.mxu1 %v87_v10  ;;  %247 = vmatpush.msra.mxu0 %v53_v11 }
   0x9   :  { %315 = vmatpush.msra.mxu3 %v151_v13  ;;  %v51_v16 = vld [vmem:[%s1808_s1 + $0xb0] sm:$0xff]  ;;  %293 = vmatpush.msra.mxu2 %v117_v12  ;;  %v49_v20 = vld [vmem:[%s1808_s1 + $0xa0] sm:$0xff]  ;;  %v56_v13 = vld [vmem:[%s1808_s1 + $0xd8] sm:$0xff] }
   0xa   :  { %v115_v17 = vld [vmem:[%s1808_s1 + $0x2b0] sm:$0xff]  ;;  %270 = vmatpush.msra.mxu1 %v85_v14  ;;  %v113_v21 = vld [vmem:[%s1808_s1 + $0x2a0] sm:$0xff]  ;;  %248 = vmatpush.msra.mxu0 %v51_v16 }
   0xb   :  { %v83_v18 = vld [vmem:[%s1808_s1 + $0x1b0] sm:$0xff]  ;;  %316 = vmatpush.msra.mxu3 %v149_v15  ;;  %294 = vmatpush.msra.mxu2 %v115_v17  ;;  %v81_v22 = vld [vmem:[%s1808_s1 + $0x1a0] sm:$0xff]  ;;  %v54_v17 = vld [vmem:[%s1808_s1 + $0xc8] sm:$0xff] }
   0xc   :  { %v147_v19 = vld [vmem:[%s1808_s1 + $0x3b0] sm:$0xff]  ;;  %v145_v23 = vld [vmem:[%s1808_s1 + $0x3a0] sm:$0xff]  ;;  %271 = vmatpush.msra.mxu1 %v83_v18  ;;  %249 = vmatpush.msra.mxu0 %v49_v20 }
   0xd   :  { %317 = vmatpush.msra.mxu3 %v147_v19  ;;  %v47_v24 = vld [vmem:[%s1808_s1 + $0x90] sm:$0xff]  ;;  %295 = vmatpush.msra.mxu2 %v113_v21  ;;  %v45_v28 = vld [vmem:[%s1808_s1 + $0x80] sm:$0xff]  ;;  %v52_v21 = vld [vmem:[%s1808_s1 + $0xb8] sm:$0xff] }
   0xe   :  { %v111_v25 = vld [vmem:[%s1808_s1 + $0x290] sm:$0xff]  ;;  %272 = vmatpush.msra.mxu1 %v81_v22  ;;  %v109_v29 = vld [vmem:[%s1808_s1 + $0x280] sm:$0xff]  ;;  %250 = vmatpush.msra.mxu0 %v47_v24 }
   0xf   :  { %v79_v26 = vld [vmem:[%s1808_s1 + $0x190] sm:$0xff]  ;;  %318 = vmatpush.msra.mxu3 %v145_v23  ;;  %296 = vmatpush.msra.mxu2 %v111_v25  ;;  %v77_v30 = vld [vmem:[%s1808_s1 + $0x180] sm:$0xff]  ;;  %v50_v25 = vld [vmem:[%s1808_s1 + $0xa8] sm:$0xff] }
  0x10   :  { %v143_v27 = vld [vmem:[%s1808_s1 + $0x390] sm:$0xff]  ;;  %v141_v31 = vld [vmem:[%s1808_s1 + $0x380] sm:$0xff]  ;;  %273 = vmatpush.msra.mxu1 %v79_v26  ;;  %251 = vmatpush.msra.mxu0 %v45_v28 }
  0x11   :  { %319 = vmatpush.msra.mxu3 %v143_v27  ;;  %v43_v32 = vld [vmem:[%s1808_s1 + $0x70] sm:$0xff]  ;;  %297 = vmatpush.msra.mxu2 %v109_v29  ;;  %v41_v36 = vld [vmem:[%s1808_s1 + $0x60] sm:$0xff] }
  0x12   :  { %v107_v33 = vld [vmem:[%s1808_s1 + $0x270] sm:$0xff]  ;;  %274 = vmatpush.msra.mxu1 %v77_v30  ;;  %v105_v37 = vld [vmem:[%s1808_s1 + $0x260] sm:$0xff]  ;;  %252 = vmatpush.msra.mxu0 %v43_v32  ;;  %v92_v32 = vld [vmem:[%s1808_s1 + $0x1f8] sm:$0xff] }
  0x13   :  { %v75_v34 = vld [vmem:[%s1808_s1 + $0x170] sm:$0xff]  ;;  %320 = vmatpush.msra.mxu3 %v141_v31  ;;  %298 = vmatpush.msra.mxu2 %v107_v33  ;;  %v73_v38 = vld [vmem:[%s1808_s1 + $0x160] sm:$0xff]  ;;  %v48_v31 = vld [vmem:[%s1808_s1 + $0x98] sm:$0xff] }
  0x14   :  { %v139_v35 = vld [vmem:[%s1808_s1 + $0x370] sm:$0xff]  ;;  %v137_v39 = vld [vmem:[%s1808_s1 + $0x360] sm:$0xff]  ;;  %275 = vmatpush.msra.mxu1 %v75_v34  ;;  %253 = vmatpush.msra.mxu0 %v41_v36  ;;  %v1303_v36 = vld [vmem:[%s1807_s0 + $0x8] sm:$0xff] }
  0x15   :  { %321 = vmatpush.msra.mxu3 %v139_v35  ;;  %v39_v40 = vld [vmem:[%s1808_s1 + $0x50] sm:$0xff]  ;;  %299 = vmatpush.msra.mxu2 %v105_v37  ;;  %v37_v44 = vld [vmem:[%s1808_s1 + $0x40] sm:$0xff]  ;;  %v1297_v35 = vld [vmem:[%s1807_s0 + $0x18] sm:$0xff] }
  0x16   :  { %v103_v41 = vld [vmem:[%s1808_s1 + $0x250] sm:$0xff]  ;;  %276 = vmatpush.msra.mxu1 %v73_v38  ;;  %v101_v45 = vld [vmem:[%s1808_s1 + $0x240] sm:$0xff]  ;;  %254 = vmatpush.msra.mxu0 %v39_v40  ;;  %v46_v37 = vld [vmem:[%s1808_s1 + $0x88] sm:$0xff] }
  0x17   :  { %v71_v42 = vld [vmem:[%s1808_s1 + $0x150] sm:$0xff]  ;;  %322 = vmatpush.msra.mxu3 %v137_v39  ;;  %300 = vmatpush.msra.mxu2 %v103_v41  ;;  %v69_v46 = vld [vmem:[%s1808_s1 + $0x140] sm:$0xff]  ;;  %v90_v38 = vld [vmem:[%s1808_s1 + $0x1e8] sm:$0xff] }
  0x18   :  { %v135_v43 = vld [vmem:[%s1808_s1 + $0x350] sm:$0xff]  ;;  %v133_v47 = vld [vmem:[%s1808_s1 + $0x340] sm:$0xff]  ;;  %277 = vmatpush.msra.mxu1 %v71_v42  ;;  %255 = vmatpush.msra.mxu0 %v37_v44  ;;  %v44_v41 = vld [vmem:[%s1808_s1 + $0x78] sm:$0xff] }
  0x19   :  { %323 = vmatpush.msra.mxu3 %v135_v43  ;;  %v35_v48 = vld [vmem:[%s1808_s1 + $0x30] sm:$0xff]  ;;  %301 = vmatpush.msra.mxu2 %v101_v45  ;;  %v33_v52 = vld [vmem:[%s1808_s1 + $0x20] sm:$0xff]  ;;  %v88_v42 = vld [vmem:[%s1808_s1 + $0x1d8] sm:$0xff] }
  0x1a   :  { %v99_v49 = vld [vmem:[%s1808_s1 + $0x230] sm:$0xff]  ;;  %278 = vmatpush.msra.mxu1 %v69_v46  ;;  %v97_v53 = vld [vmem:[%s1808_s1 + $0x220] sm:$0xff]  ;;  %256 = vmatpush.msra.mxu0 %v35_v48  ;;  %v1334_v45 = vld [vmem:[%s1807_s0 + $0x48] sm:$0xff] }
  0x1b   :  { %v67_v50 = vld [vmem:[%s1808_s1 + $0x130] sm:$0xff]  ;;  %324 = vmatpush.msra.mxu3 %v133_v47  ;;  %302 = vmatpush.msra.mxu2 %v99_v49  ;;  %v65_v54 = vld [vmem:[%s1808_s1 + $0x120] sm:$0xff]  ;;  %v42_v46 = vld [vmem:[%s1808_s1 + $0x68] sm:$0xff] }
  0x1c   :  { %v131_v51 = vld [vmem:[%s1808_s1 + $0x330] sm:$0xff]  ;;  %v129_v55 = vld [vmem:[%s1808_s1 + $0x320] sm:$0xff]  ;;  %279 = vmatpush.msra.mxu1 %v67_v50  ;;  %257 = vmatpush.msra.mxu0 %v33_v52  ;;  %v86_v47 = vld [vmem:[%s1808_s1 + $0x1c8] sm:$0xff] }
  0x1d   :  { %325 = vmatpush.msra.mxu3 %v131_v51  ;;  %v31_v56 = vld [vmem:[%s1808_s1 + $0x10] sm:$0xff]  ;;  %303 = vmatpush.msra.mxu2 %v97_v53  ;;  %v29_v60 = vld [vmem:[%s1808_s1] sm:$0xff]  ;;  %v1352_v50 = vld [vmem:[%s1807_s0 + $0x38] sm:$0xff] }
  0x1e   :  { %v95_v57 = vld [vmem:[%s1808_s1 + $0x210] sm:$0xff]  ;;  %280 = vmatpush.msra.mxu1 %v65_v54  ;;  %v93_v61 = vld [vmem:[%s1808_s1 + $0x200] sm:$0xff]  ;;  %258 = vmatpush.msra.mxu0 %v31_v56  ;;  %v40_v51 = vld [vmem:[%s1808_s1 + $0x58] sm:$0xff] }
  0x1f   :  { %v63_v58 = vld [vmem:[%s1808_s1 + $0x110] sm:$0xff]  ;;  %326 = vmatpush.msra.mxu3 %v129_v55  ;;  %304 = vmatpush.msra.mxu2 %v95_v57  ;;  %v61_v0 = vld [vmem:[%s1808_s1 + $0x100] sm:$0xff]  ;;  %v84_v52 = vld [vmem:[%s1808_s1 + $0x1b8] sm:$0xff] }
  0x20   :  { %v127_v59 = vld [vmem:[%s1808_s1 + $0x310] sm:$0xff]  ;;  %281 = vmatpush.msra.mxu1 %v63_v58  ;;  %v125_v1 = vld [vmem:[%s1808_s1 + $0x300] sm:$0xff]  ;;  %259 = vmatpush.msra.mxu0 %v29_v60  ;;  %v38_v55 = vld [vmem:[%s1808_s1 + $0x48] sm:$0xff] }
  0x21   :  { %v187_v62 = vld [vmem:[%s1808_s1 + $0x4f0] sm:$0xff]  ;;  %327 = vmatpush.msra.mxu3 %v127_v59  ;;  %305 = vmatpush.msra.mxu2 %v93_v61  ;;  %v185_v2 = vld [vmem:[%s1808_s1 + $0x4e0] sm:$0xff]  ;;  %v82_v57 = vld [vmem:[%s1808_s1 + $0x1a8] sm:$0xff] }
  0x22   :  { %v235_v63 = vld [vmem:[%s1808_s1 + $0x670] sm:$0xff]  ;;  %336 = vmatpush.msrb.mxu0 %v187_v62  ;;  %v233_v4 = vld [vmem:[%s1808_s1 + $0x660] sm:$0xff]  ;;  %282 = vmatpush.msra.mxu1 %v61_v0  ;;  %v36_v60 = vld [vmem:[%s1808_s1 + $0x38] sm:$0xff] }
  0x23   :  { %v219_v3 = vld [vmem:[%s1808_s1 + $0x5f0] sm:$0xff]  ;;  %390 = vmatpush.msrb.mxu2 %v235_v63  ;;  %328 = vmatpush.msra.mxu3 %v125_v1  ;;  %v217_v7 = vld [vmem:[%s1808_s1 + $0x5e0] sm:$0xff]  ;;  %v80_v61 = vld [vmem:[%s1808_s1 + $0x198] sm:$0xff] }
  0x24   :  { %v183_v6 = vld [vmem:[%s1808_s1 + $0x4d0] sm:$0xff]  ;;  %337 = vmatpush.msrb.mxu0 %v185_v2  ;;  %359 = vmatpush.msrb.mxu1 %v219_v3  ;;  %v181_v10 = vld [vmem:[%s1808_s1 + $0x4c0] sm:$0xff]  ;;  %v34_v1 = vld [vmem:[%s1808_s1 + $0x28] sm:$0xff] }
  0x25   :  { %v231_v8 = vld [vmem:[%s1808_s1 + $0x650] sm:$0xff]  ;;  %391 = vmatpush.msrb.mxu2 %v233_v4  ;;  %405 = vmatpush.msrb.mxu3 %v60_v5  ;;  %v229_v12 = vld [vmem:[%s1808_s1 + $0x640] sm:$0xff]  ;;  %v78_v2 = vld [vmem:[%s1808_s1 + $0x188] sm:$0xff] }
  0x26   :  { %v215_v11 = vld [vmem:[%s1808_s1 + $0x5d0] sm:$0xff]  ;;  %338 = vmatpush.msrb.mxu0 %v183_v6  ;;  %360 = vmatpush.msrb.mxu1 %v217_v7  ;;  %v213_v15 = vld [vmem:[%s1808_s1 + $0x5c0] sm:$0xff] }
  0x27   :  { %392 = vmatpush.msrb.mxu2 %v231_v8  ;;  %406 = vmatpush.msrb.mxu3 %v58_v9  ;;  %v179_v14 = vld [vmem:[%s1808_s1 + $0x4b0] sm:$0xff]  ;;  %v177_v18 = vld [vmem:[%s1808_s1 + $0x4a0] sm:$0xff] }
  0x28   :  { %339 = vmatpush.msrb.mxu0 %v181_v10  ;;  %361 = vmatpush.msrb.mxu1 %v215_v11  ;;  %v227_v16 = vld [vmem:[%s1808_s1 + $0x630] sm:$0xff]  ;;  %v225_v20 = vld [vmem:[%s1808_s1 + $0x620] sm:$0xff] }
  0x29   :  { %393 = vmatpush.msrb.mxu2 %v229_v12  ;;  %407 = vmatpush.msrb.mxu3 %v56_v13  ;;  %v211_v19 = vld [vmem:[%s1808_s1 + $0x5b0] sm:$0xff]  ;;  %v209_v23 = vld [vmem:[%s1808_s1 + $0x5a0] sm:$0xff] }
  0x2a   :  { %340 = vmatpush.msrb.mxu0 %v179_v14  ;;  %362 = vmatpush.msrb.mxu1 %v213_v15  ;;  %v175_v22 = vld [vmem:[%s1808_s1 + $0x490] sm:$0xff]  ;;  %v173_v27 = vld [vmem:[%s1808_s1 + $0x480] sm:$0xff] }
  0x2b   :  { %394 = vmatpush.msrb.mxu2 %v227_v16  ;;  %408 = vmatpush.msrb.mxu3 %v54_v17  ;;  %v223_v24 = vld [vmem:[%s1808_s1 + $0x610] sm:$0xff]  ;;  %v221_v29 = vld [vmem:[%s1808_s1 + $0x600] sm:$0xff] }
  0x2c   :  { %341 = vmatpush.msrb.mxu0 %v177_v18  ;;  %363 = vmatpush.msrb.mxu1 %v211_v19  ;;  %v1265_v26 = vld [vmem:[%s1807_s0 + $0x10] sm:$0xff]  ;;  %v1279_v30 = vld [vmem:[%s1807_s0] sm:$0xff] }
  0x2d   :  { %395 = vmatpush.msrb.mxu2 %v225_v20  ;;  %409 = vmatpush.msrb.mxu3 %v52_v21  ;;  %v207_v28 = vld [vmem:[%s1808_s1 + $0x590] sm:$0xff]  ;;  %v205_v34 = vld [vmem:[%s1808_s1 + $0x580] sm:$0xff] }
  0x2e   :  { %342 = vmatpush.msrb.mxu0 %v175_v22  ;;  %364 = vmatpush.msrb.mxu1 %v209_v23  ;;  %v171_v33 = vld [vmem:[%s1808_s1 + $0x470] sm:$0xff]  ;;  %v169_v39 = vld [vmem:[%s1808_s1 + $0x460] sm:$0xff] }
  0x2f   :  { %396 = vmatpush.msrb.mxu2 %v223_v24  ;;  %410 = vmatpush.msrb.mxu3 %v50_v25  ;;  %v203_v40 = vld [vmem:[%s1808_s1 + $0x570] sm:$0xff]  ;;  %v201_v44 = vld [vmem:[%s1808_s1 + $0x560] sm:$0xff] }
  0x30   :  { %306 = vmatmul.f32.vlgmr.msra.gmra.mxu2 %v1265_v26  ;;  %343 = vmatpush.msrb.mxu0 %v173_v27  ;;  %v167_v43 = vld [vmem:[%s1808_s1 + $0x450] sm:$0xff]  ;;  %v165_v48 = vld [vmem:[%s1808_s1 + $0x440] sm:$0xff] }
  0x31   :  { %365 = vmatpush.msrb.mxu1 %v207_v28  ;;  %397 = vmatpush.msrb.mxu2 %v221_v29  ;;  %v199_v49 = vld [vmem:[%s1808_s1 + $0x550] sm:$0xff]  ;;  %v197_v54 = vld [vmem:[%s1808_s1 + $0x540] sm:$0xff] }
  0x32   :  { %260 = vmatmul.f32.vlgmr.msra.gmra.mxu0 %v1279_v30  ;;  %411 = vmatpush.msrb.mxu3 %v48_v31  ;;  %v163_v53 = vld [vmem:[%s1808_s1 + $0x430] sm:$0xff]  ;;  %v1373_v56 = vld [vmem:[%s1807_s0 + $0x40] sm:$0xff] }
  0x33   :  { %428 = vmatpush.msra.mxu2 %v92_v32  ;;  %344 = vmatpush.msrb.mxu0 %v171_v33  ;;  %v161_v58 = vld [vmem:[%s1808_s1 + $0x420] sm:$0xff]  ;;  %v195_v59 = vld [vmem:[%s1808_s1 + $0x530] sm:$0xff] }
  0x34   :  { %366 = vmatpush.msrb.mxu1 %v205_v34  ;;  %329 = vmatmul.f32.vlgmr.msra.gmra.mxu3 %v1297_v35  ;;  %v159_v62 = vld [vmem:[%s1808_s1 + $0x410] sm:$0xff]  ;;  %v193_v63 = vld [vmem:[%s1808_s1 + $0x520] sm:$0xff] }
  0x35   :  { %283 = vmatmul.f32.vlgmr.msra.gmra.mxu1 %v1303_v36  ;;  %412 = vmatpush.msrb.mxu3 %v46_v37  ;;  %v1400_v0 = vld [vmem:[%s1807_s0 + $0x30] sm:$0xff]  ;;  %v157_v3 = vld [vmem:[%s1808_s1 + $0x400] sm:$0xff] }
  0x36   :  { %429 = vmatpush.msra.mxu2 %v90_v38  ;;  %345 = vmatpush.msrb.mxu0 %v169_v39 }
  0x37   :  { %367 = vmatpush.msrb.mxu1 %v203_v40  ;;  %413 = vmatpush.msrb.mxu3 %v44_v41 }
  0x38   :  { %430 = vmatpush.msra.mxu2 %v88_v42  ;;  %346 = vmatpush.msrb.mxu0 %v167_v43 }
  0x39   :  { %368 = vmatpush.msrb.mxu1 %v201_v44  ;;  %309 = vmatmul.f32.gmra.mxu2 %v1334_v45 }
  0x3a   :  { %414 = vmatpush.msrb.mxu3 %v42_v46  ;;  %431 = vmatpush.msra.mxu2 %v86_v47 }
  0x3b   :  { %347 = vmatpush.msrb.mxu0 %v165_v48  ;;  %369 = vmatpush.msrb.mxu1 %v199_v49 }
  0x3c   :  { %263 = vmatmul.f32.gmra.mxu0 %v1352_v50  ;;  %415 = vmatpush.msrb.mxu3 %v40_v51 }
  0x3d   :  { %432 = vmatpush.msra.mxu2 %v84_v52  ;;  %348 = vmatpush.msrb.mxu0 %v163_v53 }
  0x3e   :  { %370 = vmatpush.msrb.mxu1 %v197_v54  ;;  %416 = vmatpush.msrb.mxu3 %v38_v55 }
  0x3f   :  { %286 = vmatmul.f32.gmra.mxu1 %v1373_v56  ;;  %433 = vmatpush.msra.mxu2 %v82_v57 }
  0x40   :  { %349 = vmatpush.msrb.mxu0 %v161_v58  ;;  %371 = vmatpush.msrb.mxu1 %v195_v59 }
  0x41   :  { %417 = vmatpush.msrb.mxu3 %v36_v60  ;;  %434 = vmatpush.msra.mxu2 %v80_v61 }
  0x42   :  { %8 = vsyncpa [#allocation4], 0  ;;  %350 = vmatpush.msrb.mxu0 %v159_v62  ;;  %372 = vmatpush.msrb.mxu1 %v193_v63  ;;  %v191_v4 = vld [vmem:[%s1808_s1 + $0x510] sm:$0xff]  ;;  %v1424_v6 = vld [vmem:[%s1807_s0 + $0x20] sm:$0xff]  ;;  %s966_s19 = smov 96   ;;  %s967_s20 = smov 112  }
  0x43   :  { %v1417_v5 = vld [vmem:[%s1807_s0 + $0x50] sm:$0xff]  ;;  %915 = vmatmul.msk.f32.vlgmr.msrb.gmra.mxu2 %vm237_vm0, %v1400_v0  ;;  %418 = vmatpush.msrb.mxu3 %v34_v1  ;;  %v32_v7 = vld [vmem:[%s1808_s1 + $0x18] sm:$0xff]  ;;  %v189_v9 = vld [vmem:[%s1808_s1 + $0x500] sm:$0xff]  ;;  %vm631_vm1 = vcmask 1045504   ;;  %vm608_vm2 = vcmask 1046528   ;;  %vm674_vm3 = vcmask 1044480  }
  0x44   :  { %435 = vmatpush.msra.mxu2 %v78_v2  ;;  %351 = vmatpush.msrb.mxu0 %v157_v3  ;;  %v76_v8 = vld [vmem:[%s1808_s1 + $0x178] sm:$0xff]  ;;  %v1439_v10 = vld [vmem:[%s1807_s0 + $0x28] sm:$0xff]  ;;  %v1500_v28 = vld [vmem:[%s1807_s0 + $0x60] sm:$0xff]  ;;  %vm587_vm4 = vcmask 523268   ;;  %vm590_vm5 = vcmask 519168   ;;  %vm787_vm6 = vcmask 1043456  }
  0x45   :  { %373 = vmatpush.msrb.mxu1 %v191_v4  ;;  %332 = vmatmul.f32.gmra.mxu3 %v1417_v5  ;;  %v30_v11 = vld [vmem:[%s1808_s1 + $0x8] sm:$0xff]  ;;  %v188_v13 = vld [vmem:[%s1808_s1 + $0x4f8] sm:$0xff]  ;;  %s968_s21 = smov 64   ;;  %vm656_vm7 = vcmask 125952   ;;  %vm654_vm8 = vcmask 130050   ;;  %vm697_vm9 = vcmask 523649  }
  0x46   :  { %352 = vmatmul.f32.vlgmr.msrb.gmra.mxu0 %v1424_v6  ;;  %419 = vmatpush.msrb.mxu3 %v32_v7  ;;  %v74_v12 = vld [vmem:[%s1808_s1 + $0x168] sm:$0xff]  ;;  %v124_v14 = vld [vmem:[%s1808_s1 + $0x2f8] sm:$0xff]  ;;  %vm699_vm10 = vcmask 519552   ;;  %vm832_vm11 = vcmask 1041409   ;;  %vm812_vm12 = vcmask 1044352   ;;  %vm810_vm13 = vcmask 1048448  }
  0x47   :  { %436 = vmatpush.msra.mxu2 %v76_v8  ;;  %374 = vmatpush.msrb.mxu1 %v189_v9  ;;  %v156_v15 = vld [vmem:[%s1808_s1 + $0x3f8] sm:$0xff]  ;;  %v186_v17 = vld [vmem:[%s1808_s1 + $0x4e8] sm:$0xff]  ;;  %s969_s22 = smov 48   ;;  %vm847_vm14 = vcmask 130048   ;;  %vm849_vm15 = vcmask 261120   ;;  %s906_s28 = sshll.u32 %s1810_s3, 4  ;;  %s907_s28 = int_to_ptr.hbm [resolvable:$true] %s906_s28 }
  0x48   :  { %375 = vmatmul.f32.vlgmr.msrb.gmra.mxu1 %v1439_v10  ;;  %420 = vmatpush.msrb.mxu3 %v30_v11  ;;  %v72_v16 = vld [vmem:[%s1808_s1 + $0x158] sm:$0xff]  ;;  %v1467_v18 = vld [vmem:[%s1807_s0 + $0x68] sm:$0xff] }
  0x49   :  { %437 = vmatpush.msra.mxu2 %v74_v12  ;;  %v122_v19 = vld [vmem:[%s1808_s1 + $0x2e8] sm:$0xff]  ;;  %451 = vmatpush.msra.mxu0 %v124_v14  ;;  %v184_v21 = vld [vmem:[%s1808_s1 + $0x4d8] sm:$0xff] }
  0x4a   :  { %497 = vmatpush.msra.mxu3 %v188_v13  ;;  %v70_v20 = vld [vmem:[%s1808_s1 + $0x148] sm:$0xff]  ;;  %474 = vmatpush.msra.mxu1 %v156_v15  ;;  %v1481_v22 = vld [vmem:[%s1807_s0 + $0x58] sm:$0xff] }
  0x4b   :  { %438 = vmatpush.msra.mxu2 %v72_v16  ;;  %v154_v23 = vld [vmem:[%s1808_s1 + $0x3e8] sm:$0xff]  ;;  %452 = vmatpush.msra.mxu0 %v122_v19  ;;  %v68_v24 = vld [vmem:[%s1808_s1 + $0x138] sm:$0xff] }
  0x4c   :  { %498 = vmatpush.msra.mxu3 %v186_v17  ;;  %916 = vmatmul.msk.f32.gmra.mxu2 %vm237_vm0, %v1467_v18  ;;  %v120_v25 = vld [vmem:[%s1808_s1 + $0x2d8] sm:$0xff]  ;;  %v182_v27 = vld [vmem:[%s1808_s1 + $0x4c8] sm:$0xff] }
  0x4d   :  { %439 = vmatpush.msra.mxu2 %v70_v20  ;;  %475 = vmatpush.msra.mxu1 %v154_v23  ;;  %v66_v29 = vld [vmem:[%s1808_s1 + $0x128] sm:$0xff]  ;;  %v152_v32 = vld [vmem:[%s1808_s1 + $0x3d8] sm:$0xff] }
  0x4e   :  { %499 = vmatpush.msra.mxu3 %v184_v21  ;;  %355 = vmatmul.f32.gmra.mxu0 %v1481_v22  ;;  %v118_v31 = vld [vmem:[%s1808_s1 + $0x2c8] sm:$0xff]  ;;  %v180_v33 = vld [vmem:[%s1808_s1 + $0x4b8] sm:$0xff] }
  0x4f   :  { %440 = vmatpush.msra.mxu2 %v68_v24  ;;  %453 = vmatpush.msra.mxu0 %v120_v25  ;;  %v64_v34 = vld [vmem:[%s1808_s1 + $0x118] sm:$0xff]  ;;  %v150_v38 = vld [vmem:[%s1808_s1 + $0x3c8] sm:$0xff] }
  0x50   :  { %500 = vmatpush.msra.mxu3 %v182_v27  ;;  %378 = vmatmul.f32.gmra.mxu1 %v1500_v28  ;;  %v116_v37 = vld [vmem:[%s1808_s1 + $0x2b8] sm:$0xff]  ;;  %v178_v39 = vld [vmem:[%s1808_s1 + $0x4a8] sm:$0xff] }
  0x51   :  { %441 = vmatpush.msra.mxu2 %v66_v29  ;;  %454 = vmatpush.msra.mxu0 %v118_v31  ;;  %v62_v40 = vld [vmem:[%s1808_s1 + $0x108] sm:$0xff]  ;;  %v148_v42 = vld [vmem:[%s1808_s1 + $0x3b8] sm:$0xff] }
  0x52   :  { %476 = vmatpush.msra.mxu1 %v152_v32  ;;  %501 = vmatpush.msra.mxu3 %v180_v33  ;;  %v114_v41 = vld [vmem:[%s1808_s1 + $0x2a8] sm:$0xff]  ;;  %v176_v43 = vld [vmem:[%s1808_s1 + $0x498] sm:$0xff] }
  0x53   :  { %442 = vmatpush.msra.mxu2 %v64_v34  ;;  %455 = vmatpush.msra.mxu0 %v116_v37  ;;  %v220_v44 = vld [vmem:[%s1808_s1 + $0x5f8] sm:$0xff]  ;;  %v146_v47 = vld [vmem:[%s1808_s1 + $0x3a8] sm:$0xff] }
  0x54   :  { %477 = vmatpush.msra.mxu1 %v150_v38  ;;  %502 = vmatpush.msra.mxu3 %v178_v39  ;;  %v112_v46 = vld [vmem:[%s1808_s1 + $0x298] sm:$0xff]  ;;  %v174_v48 = vld [vmem:[%s1808_s1 + $0x488] sm:$0xff] }
  0x55   :  { %443 = vmatpush.msra.mxu2 %v62_v40  ;;  %456 = vmatpush.msra.mxu0 %v114_v41  ;;  %v218_v49 = vld [vmem:[%s1808_s1 + $0x5e8] sm:$0xff]  ;;  %v144_v52 = vld [vmem:[%s1808_s1 + $0x398] sm:$0xff] }
  0x56   :  { %478 = vmatpush.msra.mxu1 %v148_v42  ;;  %503 = vmatpush.msra.mxu3 %v176_v43  ;;  %v110_v51 = vld [vmem:[%s1808_s1 + $0x288] sm:$0xff]  ;;  %v172_v53 = vld [vmem:[%s1808_s1 + $0x478] sm:$0xff] }
  0x57   :  { %520 = vmatpush.msrb.mxu2 %v220_v44  ;;  %457 = vmatpush.msra.mxu0 %v112_v46  ;;  %v216_v54 = vld [vmem:[%s1808_s1 + $0x5d8] sm:$0xff]  ;;  %v142_v57 = vld [vmem:[%s1808_s1 + $0x388] sm:$0xff] }
  0x58   :  { %479 = vmatpush.msra.mxu1 %v146_v47  ;;  %504 = vmatpush.msra.mxu3 %v174_v48  ;;  %v108_v55 = vld [vmem:[%s1808_s1 + $0x278] sm:$0xff]  ;;  %v170_v58 = vld [vmem:[%s1808_s1 + $0x468] sm:$0xff] }
  0x59   :  { %521 = vmatpush.msrb.mxu2 %v218_v49  ;;  %421 = vmatmul.f32.vlgmr.msrb.gmra.mxu3 %v1279_v30  ;;  %v214_v59 = vld [vmem:[%s1808_s1 + $0x5c8] sm:$0xff]  ;;  %v140_v60 = vld [vmem:[%s1808_s1 + $0x378] sm:$0xff] }
  0x5a   :  { %458 = vmatpush.msra.mxu0 %v110_v51  ;;  %480 = vmatpush.msra.mxu1 %v144_v52  ;;  %v106_v30 = vld [vmem:[%s1808_s1 + $0x268] sm:$0xff]  ;;  %v168_v61 = vld [vmem:[%s1808_s1 + $0x458] sm:$0xff] }
  0x5b   :  { %505 = vmatpush.msra.mxu3 %v172_v53  ;;  %522 = vmatpush.msrb.mxu2 %v216_v54  ;;  %v212_v62 = vld [vmem:[%s1808_s1 + $0x5b8] sm:$0xff]  ;;  %v138_v1 = vld [vmem:[%s1808_s1 + $0x368] sm:$0xff] }
  0x5c   :  { %459 = vmatpush.msra.mxu0 %v108_v55  ;;  %481 = vmatpush.msra.mxu1 %v142_v57  ;;  %v104_v63 = vld [vmem:[%s1808_s1 + $0x258] sm:$0xff]  ;;  %v166_v2 = vld [vmem:[%s1808_s1 + $0x448] sm:$0xff] }
  0x5d   :  { %506 = vmatpush.msra.mxu3 %v170_v58  ;;  %523 = vmatpush.msrb.mxu2 %v214_v59  ;;  %v210_v3 = vld [vmem:[%s1808_s1 + $0x5a8] sm:$0xff]  ;;  %v136_v7 = vld [vmem:[%s1808_s1 + $0x358] sm:$0xff] }
  0x5e   :  { %460 = vmatpush.msra.mxu0 %v106_v30  ;;  %482 = vmatpush.msra.mxu1 %v140_v60  ;;  %v102_v4 = vld [vmem:[%s1808_s1 + $0x248] sm:$0xff]  ;;  %v164_v8 = vld [vmem:[%s1808_s1 + $0x438] sm:$0xff] }
  0x5f   :  { %507 = vmatpush.msra.mxu3 %v168_v61  ;;  %524 = vmatpush.msrb.mxu2 %v212_v62  ;;  %v208_v9 = vld [vmem:[%s1808_s1 + $0x598] sm:$0xff]  ;;  %v134_v12 = vld [vmem:[%s1808_s1 + $0x348] sm:$0xff] }
  0x60   :  { %461 = vmatpush.msra.mxu0 %v104_v63  ;;  %483 = vmatpush.msra.mxu1 %v138_v1  ;;  %v100_v11 = vld [vmem:[%s1808_s1 + $0x238] sm:$0xff]  ;;  %v162_v13 = vld [vmem:[%s1808_s1 + $0x428] sm:$0xff] }
  0x61   :  { %508 = vmatpush.msra.mxu3 %v166_v2  ;;  %525 = vmatpush.msrb.mxu2 %v210_v3  ;;  %v206_v14 = vld [vmem:[%s1808_s1 + $0x588] sm:$0xff]  ;;  %v132_v15 = vld [vmem:[%s1808_s1 + $0x338] sm:$0xff] }
  0x62   :  { %424 = vmatmul.f32.gmra.mxu3 %v1352_v50  ;;  %462 = vmatpush.msra.mxu0 %v102_v4  ;;  %v98_v50 = vld [vmem:[%s1808_s1 + $0x228] sm:$0xff]  ;;  %v160_v16 = vld [vmem:[%s1808_s1 + $0x418] sm:$0xff] }
  0x63   :  { %484 = vmatpush.msra.mxu1 %v136_v7  ;;  %509 = vmatpush.msra.mxu3 %v164_v8  ;;  %v204_v17 = vld [vmem:[%s1808_s1 + $0x578] sm:$0xff]  ;;  %v130_v20 = vld [vmem:[%s1808_s1 + $0x328] sm:$0xff] }
  0x64   :  { %526 = vmatpush.msrb.mxu2 %v208_v9  ;;  %463 = vmatpush.msra.mxu0 %v100_v11  ;;  %v96_v19 = vld [vmem:[%s1808_s1 + $0x218] sm:$0xff]  ;;  %v202_v21 = vld [vmem:[%s1808_s1 + $0x568] sm:$0xff] }
  0x65   :  { %444 = vmatmul.f32.vlgmr.msra.gmra.mxu2 %v1303_v36  ;;  %485 = vmatpush.msra.mxu1 %v134_v12  ;;  %v158_v36 = vld [vmem:[%s1808_s1 + $0x408] sm:$0xff]  ;;  %v128_v24 = vld [vmem:[%s1808_s1 + $0x318] sm:$0xff] }
  0x66   :  { %510 = vmatpush.msra.mxu3 %v162_v13  ;;  %527 = vmatpush.msrb.mxu2 %v206_v14  ;;  %v94_v23 = vld [vmem:[%s1808_s1 + $0x208] sm:$0xff]  ;;  %v200_v25 = vld [vmem:[%s1808_s1 + $0x558] sm:$0xff] }
  0x67   :  { %464 = vmatpush.msra.mxu0 %v98_v50  ;;  %486 = vmatpush.msra.mxu1 %v132_v15  ;;  %v126_v27 = vld [vmem:[%s1808_s1 + $0x308] sm:$0xff]  ;;  %v236_v31 = vld [vmem:[%s1808_s1 + $0x678] sm:$0xff] }
  0x68   :  { %511 = vmatpush.msra.mxu3 %v160_v16  ;;  %528 = vmatpush.msrb.mxu2 %v204_v17  ;;  %v198_v29 = vld [vmem:[%s1808_s1 + $0x548] sm:$0xff]  ;;  %v228_v37 = vld [vmem:[%s1808_s1 + $0x638] sm:$0xff] }
  0x69   :  { %465 = vmatpush.msra.mxu0 %v96_v19  ;;  %487 = vmatpush.msra.mxu1 %v130_v20  ;;  %v234_v32 = vld [vmem:[%s1808_s1 + $0x668] sm:$0xff] }
  0x6a   :  { %512 = vmatpush.msra.mxu3 %v158_v36  ;;  %529 = vmatpush.msrb.mxu2 %v202_v21  ;;  %v194_v33 = vld [vmem:[%s1808_s1 + $0x528] sm:$0xff] }
  0x6b   :  { %513 = vmatmul.f32.vlgmr.msra.gmra.mxu3 %v1424_v6  ;;  %466 = vmatpush.msra.mxu0 %v94_v23  ;;  %v196_v6 = vld [vmem:[%s1808_s1 + $0x538] sm:$0xff]  ;;  %v190_v34 = vld [vmem:[%s1808_s1 + $0x508] sm:$0xff] }
  0x6c   :  { %488 = vmatpush.msra.mxu1 %v128_v24  ;;  %530 = vmatpush.msrb.mxu2 %v200_v25  ;;  %v222_v38 = vld [vmem:[%s1808_s1 + $0x608] sm:$0xff] }
  0x6d   :  { %447 = vmatmul.f32.gmra.mxu2 %v1373_v56  ;;  %467 = vmatmul.f32.vlgmr.msra.gmra.mxu0 %v1265_v26  ;;  %v232_v26 = vld [vmem:[%s1808_s1 + $0x658] sm:$0xff] }
  0x6e   :  { %489 = vmatpush.msra.mxu1 %v126_v27  ;;  %531 = vmatpush.msrb.mxu2 %v198_v29  ;;  %v192_v56 = vld [vmem:[%s1808_s1 + $0x518] sm:$0xff] }
  0x6f   :  { %490 = vmatmul.f32.vlgmr.msra.gmra.mxu1 %v1297_v35  ;;  %551 = vmatpush.msrb.mxu0 %v236_v31  ;;  %v230_v35 = vld [vmem:[%s1808_s1 + $0x648] sm:$0xff] }
  0x70   :  { %532 = vmatpush.msrb.mxu2 %v196_v6  ;;  %919 = vmatpush.msrb.mxu1 %v236_v31 }
  0x71   :  { %552 = vmatpush.msrb.mxu0 %v234_v32 }
  0x72   :  { %533 = vmatpush.msrb.mxu2 %v194_v33  ;;  %920 = vmatpush.msrb.mxu1 %v234_v32 }
  0x73   :  { %516 = vmatmul.f32.gmra.mxu3 %v1481_v22  ;;  %553 = vmatpush.msrb.mxu0 %v232_v26  ;;  %v226_v22 = vld [vmem:[%s1808_s1 + $0x628] sm:$0xff] }
  0x74   :  { %534 = vmatpush.msrb.mxu2 %v192_v56  ;;  %921 = vmatpush.msrb.mxu1 %v232_v26 }
  0x75   :  { %470 = vmatmul.f32.gmra.mxu0 %v1334_v45  ;;  %v224_v45 = vld [vmem:[%s1808_s1 + $0x618] sm:$0xff]  ;;  %s965_s1 = smov 80  }
  0x76   :  { %554 = vmatpush.msrb.mxu0 %v230_v35  ;;  %535 = vmatpush.msrb.mxu2 %v190_v34 }
  0x77   :  { %493 = vmatmul.f32.gmra.mxu1 %v1417_v5  ;;  %536 = vmatmul.f32.vlgmr.msrb.gmra.mxu2 %v1439_v10  ;;  %v964_v5 = vmov 0.0  }
  0x78   :  { %555 = vmatpush.msrb.mxu0 %v228_v37  ;;  %922 = vmatpush.msrb.mxu1 %v230_v35  ;;  %566 = vst [vmem:[#allocation2] sm:$0xff] %v964_v5 }
  0x79   :  { %568 = vst [vmem:[#allocation2 + $0x10] sm:$0xff] %v964_v5 }
  0x7a   :  { %556 = vmatpush.msrb.mxu0 %v226_v22  ;;  %923 = vmatpush.msrb.mxu1 %v228_v37  ;;  %567 = vst.msk [vmem:[#allocation2 + $0x8] sm:$0xff] %vm237_vm0, %v964_v5 }
  0x7b   :  { %569 = vst.msk [vmem:[#allocation2 + $0x18] sm:$0xff] %vm237_vm0, %v964_v5 }
  0x7c   :  { %557 = vmatpush.msrb.mxu0 %v224_v45  ;;  %924 = vmatpush.msrb.mxu1 %v226_v22  ;;  %570 = vst [vmem:[#allocation2 + $0x20] sm:$0xff] %v964_v5 }
  0x7d   :  { %571 = vst.msk [vmem:[#allocation2 + $0x28] sm:$0xff] %vm237_vm0, %v964_v5 }
  0x7e   :  { %558 = vmatpush.msrb.mxu0 %v222_v38  ;;  %925 = vmatpush.msrb.mxu1 %v224_v45  ;;  %572 = vst [vmem:[#allocation2 + $0x30] sm:$0xff] %v964_v5 }
  0x7f   :  { %539 = vmatmul.f32.gmra.mxu2 %v1500_v28  ;;  %917 = vmatmul.msk.f32.vlgmr.msrb.gmra.mxu0 %vm237_vm0, %v1400_v0  ;;  %573 = vst.msk [vmem:[#allocation2 + $0x38] sm:$0xff] %vm237_vm0, %v964_v5 }
  0x80   :  { %926 = vmatpush.msrb.mxu1 %v222_v38 }
  0x81   :  { %918 = vmatmul.msk.f32.vlgmr.msrb.gmra.mxu1 %vm237_vm0, %v1467_v18  ;;  %vm863_vm0 = vcmask 388098  }
  0xaf   :  { %v261_v10 = vpop.f32.mrf.mxu0 }
  0xb2   :  { %v284_v28 = vpop.f32.mrf.mxu1 }
  0xb3   :  { %v307_v0 = vpop.f32.mrf.mxu2  ;;  %v285_v40 = vadd.f32 %v284_v28, %v261_v10 }
  0xb5   :  { %v308_v42 = vadd.f32 %v307_v0, %v285_v40 }
  0xb7   :  { %v330_v43 = vpop.f32.mrf.mxu3 }
  0xb8   :  { %v331_v46 = vadd.f32 %v330_v43, %v308_v42 }
  0xb9   :  { %v264_v39 = vpop.f32.mrf.mxu0 }
  0xbc   :  { %v287_v41 = vpop.f32.mrf.mxu1  ;;  %v310_v18 = vpop.f32.mrf.mxu2 }
  0xbd   :  { %v288_v44 = vadd.f32 %v287_v41, %v264_v39 }
  0xbf   :  { %v311_v49 = vadd.f32 %v310_v18, %v288_v44 }
  0xc3   :  { %v353_v47 = vpop.f32.mrf.mxu0 }
  0xc4   :  { %v354_v48 = vadd.f32 %v353_v47, %v331_v46 }
  0xc5   :  { %v376_v51 = vpop.f32.mrf.mxu1 }
  0xc6   :  { %v377_v52 = vadd.f32 %v376_v51, %v354_v48  ;;  %v399_v53 = vpop.f32.mrf.mxu2 }
  0xc8   :  { %v400_v54 = vadd.f32 %v399_v53, %v377_v52  ;;  %v333_v55 = vpop.f32.mrf.mxu3 }
  0xc9   :  { %v334_v57 = vadd.f32 %v333_v55, %v311_v49 }
  0xca   :  { %v578_v58 = vrot.slane %v400_v54, 4 }
  0xcb   :  { %v356_v59 = vpop.f32.mrf.mxu0 }
  0xcc   :  { %586 = vst [vmem:[#allocation2] sm:$0xf0] %v578_v58  ;;  %v357_v30 = vadd.f32 %v356_v59, %v334_v57 }
  0xcd   :  { %589 = vst [vmem:[#allocation2 + $0x10] sm:$0xf] %v578_v58  ;;  %v379_v60 = vpop.f32.mrf.mxu1 }
  0xce   :  { %v380_v61 = vadd.f32 %v379_v60, %v357_v30 }
  0xcf   :  { %v402_v62 = vpop.f32.mrf.mxu2 }
  0xd0   :  { %v403_v63 = vadd.f32 %v402_v62, %v380_v61 }
  0xd2   :  { %v580_v1 = vrot.slane %v403_v63, 4 }
  0xd3   :  { %v1729_v8 = vld [vmem:[#allocation2] sm:$0xff] }
  0xd4   :  { %592 = vst [vmem:[#allocation2 + $0x20] sm:$0xf0] %v580_v1  ;;  %v1722_v2 = vld [vmem:[#allocation2 + $0x10] sm:$0xff]  ;;  %v632_v9 = vrot.slane %v1729_v8, 2  ;;  %v609_v11 = vrot.slane %v1729_v8, 1  ;;  %v675_v20 = vrot.slane %v1729_v8, 3 }
  0xd5   :  { %594 = vst [vmem:[#allocation2 + $0x30] sm:$0xf] %v580_v1  ;;  %v676_v3 = vrot.slane %v1722_v2, 3  ;;  %v633_v4 = vrot.slane %v1722_v2, 2  ;;  %v610_v7 = vrot.slane %v1722_v2, 1 }
  0xd7   :  { %683 = vrot.lane.b32.xlu0 %v676_v3, %s965_s1  ;;  %640 = vrot.lane.b32.xlu1 %v633_v4, %s966_s19  ;;  %v634_v50 = vsel %vm631_vm1, %v632_v9, %v633_v4  ;;  %v611_v15 = vsel %vm608_vm2, %v609_v11, %v610_v7  ;;  %v677_v23 = vsel %vm674_vm3, %v675_v20, %v676_v3 }
  0xd8   :  { %617 = vrot.lane.b32.xlu2 %v610_v7, %s967_s20 }
  0xdb   :  { %v1737_v14 = vld [vmem:[#allocation2 + $0x20] sm:$0xff] }
  0xdc   :  { %v1734_v12 = vld [vmem:[#allocation2 + $0x30] sm:$0xff]  ;;  %v422_v16 = vpop.f32.mrf.mxu3  ;;  %v678_v17 = vrot.slane %v1737_v14, 3  ;;  %v612_v29 = vrot.slane %v1737_v14, 1  ;;  %v635_v56 = vrot.slane %v1737_v14, 2 }
  0xdd   :  { %v613_v13 = vrot.slane %v1734_v12, 1  ;;  %v679_v19 = vrot.slane %v1734_v12, 3  ;;  %v636_v36 = vrot.slane %v1734_v12, 2 }
  0xdf   :  { %638 = vrot.lane.b32.xlu0 %v634_v50, %s966_s19  ;;  %621 = vrot.lane.b32.xlu1 %v613_v13, %s967_s20  ;;  %v680_v21 = vsel %vm674_vm3, %v678_v17, %v679_v19  ;;  %v614_v6 = vsel %vm608_vm2, %v612_v29, %v613_v13  ;;  %v637_v45 = vsel %vm631_vm1, %v635_v56, %v636_v36 }
  0xe0   :  { %615 = vrot.lane.b32.xlu2 %v611_v15, %s967_s20 }
  0xe5   :  { %v425_v25 = vpop.f32.mrf.mxu3 }
  0xe7   :  { %644 = vrot.lane.b32.xlu0 %v636_v36, %s966_s19  ;;  %685 = vrot.lane.b32.xlu1 %v680_v21, %s965_s1 }
  0xe8   :  { %v445_v24 = vpop.f32.mrf.mxu2  ;;  %681 = vrot.lane.b32.xlu2 %v677_v23, %s965_s1 }
  0xe9   :  { %v446_v31 = vadd.f32 %v445_v24, %v422_v16 }
  0xea   :  { %v468_v27 = vpop.f32.mrf.mxu0 }
  0xeb   :  { %v469_v33 = vadd.f32 %v468_v27, %v446_v31 }
  0xec   :  { %v491_v32 = vpop.f32.mrf.mxu1 }
  0xed   :  { %v492_v37 = vadd.f32 %v491_v32, %v469_v33 }
  0xee   :  { %v514_v35 = vpop.f32.mrf.mxu3 }
  0xef   :  { %619 = vrot.lane.b32.xlu0 %v614_v6, %s967_s20  ;;  %v515_v38 = vadd.f32 %v514_v35, %v492_v37 }
  0xf0   :  { %687 = vrot.lane.b32.xlu2 %v679_v19, %s965_s1  ;;  %v448_v26 = vpop.f32.mrf.mxu2 }
  0xf1   :  { %v449_v22 = vadd.f32 %v448_v26, %v425_v25 }
  0xf2   :  { %v471_v34 = vpop.f32.mrf.mxu0 }
  0xf3   :  { %v472_v5 = vadd.f32 %v471_v34, %v449_v22 }
  0xf4   :  { %v494_v10 = vpop.f32.mrf.mxu1 }
  0xf5   :  { %v495_v40 = vadd.f32 %v494_v10, %v472_v5 }
  0xf6   :  { %v517_v18 = vpop.f32.mrf.mxu3 }
  0xf7   :  { %v518_v43 = vadd.f32 %v517_v18, %v495_v40 }
  0xf8   :  { %642 = vrot.lane.b32.xlu2 %v637_v45, %s966_s19 }
  0xfa   :  { %v537_v28 = vpop.f32.mrf.mxu2 }
  0xfb   :  { %v538_v0 = vadd.f32 %v537_v28, %v515_v38 }
  0xfc   :  { %v560_v39 = vpop.f32.mrf.mxu0 }
  0xfd   :  { %v561_v41 = vadd.f32 %v560_v39, %v538_v0 }
  0xfe   :  { %v563_v46 = vpop.f32.mrf.mxu1 }
  0xff   :  { %v579_v42 = vrot.slane %v561_v41, 4 }
 0x101   :  { %588 = vst.msk [vmem:[#allocation2 + $0x8] sm:$0xf0] %vm587_vm4, %v579_v42 }
 0x102   :  { %591 = vst.msk [vmem:[#allocation2 + $0x18] sm:$0xf] %vm590_vm5, %v579_v42  ;;  %v540_v44 = vpop.f32.mrf.mxu2 }
 0x103   :  { %v541_v47 = vadd.f32 %v540_v44, %v518_v43 }
 0x105   :  { %v564_v48 = vadd.f32 %v563_v46, %v541_v47 }
 0x107   :  { %v581_v49 = vrot.slane %v564_v48, 4 }
 0x108   :  { %v597_v51 = vld [vmem:[#allocation2 + $0x8] sm:$0xff] }
 0x109   :  { %593 = vst.msk [vmem:[#allocation2 + $0x28] sm:$0xf0] %vm587_vm4, %v581_v49  ;;  %v599_v52 = vld [vmem:[#allocation2 + $0x18] sm:$0xff]  ;;  %v765_v53 = vrot.slane %v597_v51, 3  ;;  %v743_v58 = vrot.slane %v597_v51, 2  ;;  %v721_v62 = vrot.slane %v597_v51, 1 }
 0x10a   :  { %595 = vst.msk [vmem:[#allocation2 + $0x38] sm:$0xf] %vm590_vm5, %v581_v49  ;;  %v766_v54 = vrot.slane %v599_v52, 3  ;;  %v722_v55 = vrot.slane %v599_v52, 1  ;;  %v744_v59 = vrot.slane %v599_v52, 2  ;;  %v788_v11 = vrot.slane %v597_v51, 4 }
 0x10b   :  { %v789_v13 = vrot.slane %v599_v52, 4 }
 0x10c   :  { %773 = vrot.lane.b32.xlu2 %v766_v54, %s965_s1  ;;  %729 = vrot.lane.b32.xlu0 %v722_v55, %s967_s20  ;;  %v767_v57 = vsel %vm674_vm3, %v765_v53, %v766_v54  ;;  %v745_v61 = vsel %vm631_vm1, %v743_v58, %v744_v59  ;;  %v723_v1 = vsel %vm608_vm2, %v721_v62, %v722_v55 }
 0x10d   :  { %771 = vrot.lane.b32.xlu1 %v767_v57, %s965_s1  ;;  %v790_v16 = vsel %vm787_vm6, %v788_v11, %v789_v13 }
 0x110   :  { %v601_v4 = vld [vmem:[#allocation2 + $0x28] sm:$0xff] }
 0x111   :  { %v603_v30 = vld [vmem:[#allocation2 + $0x38] sm:$0xff]  ;;  %v791_v7 = vrot.slane %v601_v4, 4  ;;  %v724_v50 = vrot.slane %v601_v4, 1  ;;  %v768_v19 = vrot.slane %v601_v4, 3  ;;  %v746_v20 = vrot.slane %v601_v4, 2 }
 0x112   :  { %v725_v60 = vrot.slane %v603_v30, 1  ;;  %v747_v63 = vrot.slane %v603_v30, 2  ;;  %v769_v3 = vrot.slane %v603_v30, 3  ;;  %v792_v9 = vrot.slane %v603_v30, 4 }
 0x114   :  { %749 = vrot.lane.b32.xlu2 %v745_v61, %s966_s19  ;;  %751 = vrot.lane.b32.xlu0 %v744_v59, %s966_s19  ;;  %v793_v15 = vsel %vm787_vm6, %v791_v7, %v792_v9  ;;  %v726_v17 = vsel %vm608_vm2, %v724_v50, %v725_v60  ;;  %v770_v36 = vsel %vm674_vm3, %v768_v19, %v769_v3  ;;  %vm897_vm2 = vcmask 11266  }
 0x115   :  { %733 = vrot.lane.b32.xlu1 %v725_v60, %s967_s20  ;;  %v748_v21 = vsel %vm631_vm1, %v746_v20, %v747_v63  ;;  %vm894_vm1 = vcmask 1043459  }
 0x11c   :  { %755 = vrot.lane.b32.xlu2 %v747_v63, %s966_s19  ;;  %727 = vrot.lane.b32.xlu0 %v723_v1, %s967_s20 }
 0x11d   :  { %777 = vrot.lane.b32.xlu1 %v769_v3, %s965_s1 }
 0x124   :  { %798 = vrot.lane.b32.xlu2 %v793_v15, %s968_s21  ;;  %794 = vrot.lane.b32.xlu0 %v790_v16, %s968_s21 }
 0x125   :  { %731 = vrot.lane.b32.xlu1 %v726_v17, %s967_s20 }
 0x12c   :  { %775 = vrot.lane.b32.xlu0 %v770_v36, %s965_s1 }
 0x12d   :  { %753 = vrot.lane.b32.xlu1 %v748_v21, %s966_s19 }
 0x132   :  { %v618_v23 = vpop.permute.xlu2 %617 }
 0x133   :  { %v628_v29 = vadd.f32 %v618_v23, %v1722_v2 }
 0x134   :  { %800 = vrot.lane.b32.xlu0 %v792_v9, %s968_s21 }
 0x135   :  { %796 = vrot.lane.b32.xlu1 %v789_v13, %s968_s21 }
 0x13a   :  { %v616_v24 = vpop.permute.xlu2 %615 }
 0x13b   :  { %v627_v6 = vadd.f32 %v616_v24, %v1729_v8 }
 0x142   :  { %v682_v31 = vpop.permute.xlu2 %681 }
 0x149   :  { %v684_v25 = vpop.permute.xlu0 %683  ;;  %v641_v27 = vpop.permute.xlu1 %640 }
 0x14a   :  { %v651_v32 = vadd.f32 %v641_v27, %v628_v29  ;;  %v688_v45 = vpop.permute.xlu2 %687 }
 0x14c   :  { %v657_v56 = vsel %vm656_vm7, %v651_v32, -inf  ;;  %v694_v22 = vadd.f32 %v684_v25, %v651_v32 }
 0x14e   :  { %v700_v28 = vsel %vm699_vm10, %v694_v22, -inf }
 0x151   :  { %v639_v33 = vpop.permute.xlu0 %638  ;;  %v622_v10 = vpop.permute.xlu1 %621 }
 0x152   :  { %v650_v26 = vadd.f32 %v639_v33, %v627_v6  ;;  %v630_v39 = vadd.f32 %v622_v10, %v1734_v12  ;;  %v643_v46 = vpop.permute.xlu2 %642 }
 0x154   :  { %v655_v35 = vsel %vm654_vm8, %v650_v26, -inf  ;;  %v693_v37 = vadd.f32 %v682_v31, %v650_v26 }
 0x155   :  { %v658_v34 = vmax.f32 %v655_v35, %v657_v56 }
 0x156   :  { %v698_v5 = vsel %vm697_vm9, %v693_v37, -inf }
 0x157   :  { %v701_v0 = vmax.f32 %v698_v5, %v700_v28  ;;  %v659_v40 = vrot.slane %v658_v34, 4 }
 0x159   :  { %v645_v38 = vpop.permute.xlu0 %644  ;;  %v702_v18 = vrot.slane %v701_v0, 4  ;;  %v660_v44 = vmax.f32 %v658_v34, %v659_v40  ;;  %v686_v51 = vpop.permute.xlu1 %685 }
 0x15a   :  { %v653_v41 = vadd.f32 %v645_v38, %v630_v39 }
 0x15b   :  { %v703_v49 = vmax.f32 %v701_v0, %v702_v18  ;;  %v661_v55 = vrot.slane %v660_v44, 2 }
 0x15c   :  { %v696_v47 = vadd.f32 %v688_v45, %v653_v41  ;;  %v666_v52 = vsel %vm656_vm7, %v653_v41, -inf }
 0x15d   :  { %v704_v30 = vrot.slane %v703_v49, 2  ;;  %v662_v62 = vmax.f32 %v660_v44, %v661_v55 }
 0x15e   :  { %v709_v58 = vsel %vm699_vm10, %v696_v47, -inf }
 0x15f   :  { %v705_v7 = vmax.f32 %v703_v49, %v704_v30  ;;  %v663_v9 = vrot.slane %v662_v62, 1 }
 0x161   :  { %v620_v42 = vpop.permute.xlu0 %619  ;;  %v706_v50 = vrot.slane %v705_v7, 1  ;;  %v664_v19 = vmax.f32 %v662_v62, %v663_v9  ;;  %v872_v9 = vlaneseq }
 0x162   :  { %v629_v43 = vadd.f32 %v620_v42, %v1737_v14 }
 0x163   :  { %v707_v36 = vmax.f32 %v705_v7, %v706_v50  ;;  %v851_v50 = vld [vmem:[%s1809_s2] sm:$0xf]  ;;  %s971_s2 = smov [#allocation3]  }
 0x164   :  { %v652_v48 = vadd.f32 %v643_v46, %v629_v43  ;;  %s904_s25 = sshll.u32 %s971_s2, 4  ;;  %s905_s25 = int_to_ptr.vmem [resolvable:$true] %s904_s25 }
 0x166   :  { %v665_v53 = vsel %vm654_vm8, %v652_v48, -inf  ;;  %v695_v54 = vadd.f32 %v686_v51, %v652_v48  ;;  %v774_v29 = vpop.permute.xlu2 %773 }
 0x167   :  { %v667_v57 = vmax.f32 %v665_v53, %v666_v52 }
 0x168   :  { %v708_v59 = vsel %vm697_vm9, %v695_v54, -inf }
 0x169   :  { %v668_v60 = vrot.slane %v667_v57, 4  ;;  %v710_v61 = vmax.f32 %v708_v59, %v709_v58 }
 0x16b   :  { %v669_v63 = vmax.f32 %v667_v57, %v668_v60  ;;  %v711_v1 = vrot.slane %v710_v61, 4 }
 0x16d   :  { %v670_v3 = vrot.slane %v669_v63, 2  ;;  %v712_v4 = vmax.f32 %v710_v61, %v711_v1 }
 0x16e   :  { %v750_v26 = vpop.permute.xlu2 %749 }
 0x16f   :  { %v671_v11 = vmax.f32 %v669_v63, %v670_v3  ;;  %v713_v13 = vrot.slane %v712_v4, 2 }
 0x171   :  { %v714_v15 = vmax.f32 %v712_v4, %v713_v13  ;;  %v672_v16 = vrot.slane %v671_v11, 1 }
 0x173   :  { %v715_v17 = vrot.slane %v714_v15, 1  ;;  %v673_v20 = vmax.f32 %v671_v11, %v672_v16  ;;  %v873_v11 = vshrl.u32 %v872_v9, 7 }
 0x175   :  { %v716_v21 = vmax.f32 %v714_v15, %v715_v17  ;;  %v1791_v23 = vsel %vm832_vm11, %v673_v20, %v664_v19  ;;  %v874_v13 = vadd.s32 4294967294, %v873_v11  ;;  %v870_v15 = vperm.slane %v851_v50, 1 }
 0x176   :  { %v756_v34 = vpop.permute.xlu2 %755  ;;  %v852_v17 = vperm.slane %v851_v50, 0 }
 0x177   :  { %v837_v24 = vsel %vm832_vm11, %v716_v21, %v707_v36  ;;  %935 = vset.pattern.permute.xlu2 %v874_v13 }
 0x178   :  { %838 = vrot.lane.b32.xlu1 %v837_v24, %s966_s19 }
 0x17e   :  { %v730_v25 = vpop.permute.xlu0 %729  ;;  %v799_v18 = vpop.permute.xlu2 %798 }
 0x17f   :  { %v772_v27 = vpop.permute.xlu1 %771  ;;  %v740_v10 = vadd.f32 %v730_v25, %v1722_v2 }
 0x186   :  { %v752_v31 = vpop.permute.xlu0 %751 }
 0x187   :  { %v734_v6 = vpop.permute.xlu1 %733  ;;  %v762_v39 = vadd.f32 %v752_v31, %v740_v10 }
 0x188   :  { %v742_v38 = vadd.f32 %v734_v6, %v1734_v12 }
 0x189   :  { %v784_v47 = vadd.f32 %v774_v29, %v762_v39 }
 0x18a   :  { %v764_v41 = vadd.f32 %v756_v34, %v742_v38 }
 0x18e   :  { %v728_v32 = vpop.permute.xlu0 %727 }
 0x18f   :  { %v778_v33 = vpop.permute.xlu1 %777  ;;  %v739_v37 = vadd.f32 %v728_v32, %v1729_v8 }
 0x190   :  { %v786_v43 = vadd.f32 %v778_v33, %v764_v41 }
 0x191   :  { %v761_v28 = vadd.f32 %v750_v26, %v739_v37  ;;  %v970_v26 = vmov 0  }
 0x192   :  { %937 = vset.pattern.permute.xlu0 %v970_v26 }
 0x193   :  { %v783_v42 = vadd.f32 %v772_v27, %v761_v28 }
 0x196   :  { %v795_v56 = vpop.permute.xlu0 %794 }
 0x197   :  { %v732_v35 = vpop.permute.xlu1 %731  ;;  %v806_v46 = vadd.f32 %v795_v56, %v783_v42 }
 0x198   :  { %v741_v22 = vadd.f32 %v732_v35, %v1737_v14 }
 0x199   :  { %v811_v2 = vsel %vm810_vm13, %v806_v46, -inf }
 0x19e   :  { %v776_v45 = vpop.permute.xlu0 %775 }
 0x19f   :  { %v754_v5 = vpop.permute.xlu1 %753 }
 0x1a0   :  { %v763_v0 = vadd.f32 %v754_v5, %v741_v22 }
 0x1a2   :  { %v785_v40 = vadd.f32 %v776_v45, %v763_v0  ;;  %v890_v45 = vand.u32 127, %v872_v9 }
 0x1a4   :  { %v808_v44 = vadd.f32 %v799_v18, %v785_v40  ;;  %v891_v38 = vadd.s32 2, %v890_v45 }
 0x1a6   :  { %v801_v8 = vpop.permute.xlu0 %800  ;;  %v821_v49 = vsel %vm810_vm13, %v808_v44, -inf }
 0x1a7   :  { %v809_v14 = vadd.f32 %v801_v8, %v786_v43  ;;  %v797_v48 = vpop.permute.xlu1 %796 }
 0x1a8   :  { %v807_v12 = vadd.f32 %v797_v48, %v784_v47 }
 0x1a9   :  { %v822_v51 = vsel %vm812_vm12, %v809_v14, -inf }
 0x1aa   :  { %v823_v52 = vmax.f32 %v821_v49, %v822_v51  ;;  %v813_v53 = vsel %vm812_vm12, %v807_v12, -inf }
 0x1ab   :  { %v814_v54 = vmax.f32 %v811_v2, %v813_v53 }
 0x1ac   :  { %v824_v55 = vrot.slane %v823_v52, 4 }
 0x1ad   :  { %v815_v57 = vrot.slane %v814_v54, 4 }
 0x1ae   :  { %v825_v58 = vmax.f32 %v823_v52, %v824_v55 }
 0x1af   :  { %v816_v59 = vmax.f32 %v814_v54, %v815_v57 }
 0x1b0   :  { %v826_v30 = vrot.slane %v825_v58, 2 }
 0x1b1   :  { %v817_v60 = vrot.slane %v816_v59, 2 }
 0x1b2   :  { %v827_v61 = vmax.f32 %v825_v58, %v826_v30 }
 0x1b3   :  { %v818_v62 = vmax.f32 %v816_v59, %v817_v60 }
 0x1b4   :  { %v828_v63 = vrot.slane %v827_v61, 1 }
 0x1b5   :  { %v819_v1 = vrot.slane %v818_v62, 1 }
 0x1b6   :  { %v829_v3 = vmax.f32 %v827_v61, %v828_v63 }
 0x1b7   :  { %v820_v4 = vmax.f32 %v818_v62, %v819_v1 }
 0x1b9   :  { %v843_v7 = vsel %vm832_vm11, %v829_v3, %v820_v4 }
 0x1ba   :  { %844 = vrot.lane.b32.xlu2 %v843_v7, %s969_s22 }
 0x1c2   :  { %876 = vperm.xlu2 %935, %v870_v15  }
 0x1ca   :  { %936 = vset.pattern.permute.xlu2 %v970_v26 }
 0x1ea   :  { %v839_v16 = vpop.permute.xlu1 %838 }
 0x1eb   :  { %v848_v19 = vsel %vm847_vm14, %v1791_v23, %v839_v16 }
 0x214   :  { %v845_v20 = vpop.permute.xlu2 %844 }
 0x215   :  { %v850_v36 = vsel %vm849_vm15, %v848_v19, %v845_v20 }
 0x216   :  { %v853_v21 = vadd.f32 %v852_v17, %v850_v36 }
 0x218   :  { %v854_v24 = vmax.f32 %v853_v21, 0.0 }
 0x21a   :  { %v857_v25 = vperm.slane %v854_v24, 0  ;;  %v856_v27 = vrot.slane %v854_v24, 1 }
 0x21c   :  { %v861_v29 = vmul.f32 %v857_v25, %v851_v50  ;;  %v858_v31 = vperm.slane %v856_v27, 0  ;;  %v877_v56 = vpop.permute.xlu2 %876 }
 0x21e   :  { %v864_v6 = vsel %vm863_vm0, %v861_v29, 0.0  ;;  %v862_v32 = vmul.f32 %v858_v31, %v851_v50 }
 0x21f   :  { %865 = vadd.xlane.f32.xlu0 %v864_v6 }
 0x220   :  { %v867_v33 = vsel %vm863_vm0, %v862_v32, 0.0 }
 0x221   :  { %868 = vadd.xlane.f32.xlu1 %v867_v33 }
 0x292   :  { %v866_v35 = vpop.xlane.xlu0 %865 }
 0x293   :  { %v879_v23 = vadd.f32 %v877_v56, %v866_v35 }
 0x294   :  { %v869_v34 = vpop.xlane.xlu1 %868 }
 0x295   :  { %884 = vperm.xlu2 %936, %v879_v23   ;;  %v880_v37 = vadd.f32 %v877_v56, %v869_v34 }
 0x29d   :  { %887 = vperm.xlu2 %936, %v880_v37  }
 0x2ef   :  { %v885_v22 = vpop.permute.xlu2 %884 }
 0x2f0   :  { %v892_v10 = vperm.slane %v885_v22, %v891_v38 }
 0x2f7   :  { %v888_v5 = vpop.permute.xlu2 %887 }
 0x2f8   :  { %v893_v28 = vperm.slane %v888_v5, %v891_v38 }
 0x2fa   :  { %v895_v0 = vsel %vm894_vm1, %v893_v28, %v892_v10 }
 0x2fb   :  { %898 = vst.msk [vmem:[#allocation3 - $0x2] sm:$0xc] %vm897_vm2, %v895_v0 }
 0x2fc   :  { %909 = dma.vmem_to_hbm [thread:$0]  %s905_s25, 32, %s907_s28, [#allocation4]  }
 0x2fd   :  { %962 = dma.done.wait [#allocation4], 32  }
 0x2fe   :  { %963 = vsyncadd [#allocation4], 4294967264 }
 0x2ff   :  { %914 = vsyncpa [#allocation4], 1 }

</bundles_post_ra>
